<compile_context>
chip_gen: v6e
topology: v6e:2x2x1
jax: 0.10.0
libtpu: 0.0.40
codegen_flags: <defaults>
</compile_context>

<pallas_src>
import functools

import jax
import jax.numpy as jnp
from jax.experimental import pallas as pl
from jax.experimental.pallas import tpu as pltpu

# ---------------------------------------------------------------------------
# Problem sizes (small, deterministic demo shapes)
# ---------------------------------------------------------------------------
BS = 2            # episode batch
SEQ = 4           # timesteps
N_AGENTS = 8
Q_EMBED = 1       # q_embed_dim
STATE_DIM = 32
EMBED_DIM = 32
NAQ = N_AGENTS * Q_EMBED       # 8

GATED = True
SKIP_CONNECTIONS = True

# Fused hypernet projection row layout (rows of packed weight / of `proj`).
OFF_W1 = 0                           # |.| -> per-agent mixing weights (NAQ*E rows)
OFF_B1 = OFF_W1 + NAQ * EMBED_DIM    # 256: hyper_b_1
OFF_WF = OFF_B1 + EMBED_DIM          # 288: |.| -> hyper_w_final
OFF_V1 = OFF_WF + EMBED_DIM          # 320: relu -> V hidden
HYPER_OUT = OFF_V1 + EMBED_DIM       # 352 real rows
HYPER_OUT_PAD = 384                  # padded to a nice multiple

# Batch tile (lane dimension): multiple of 128 (v5e MXU/lanes) and 256 (v6e/v7x).
MAX_TB = 512


def _round_up(x, m):
    return (x + m - 1) // m * m


# ---------------------------------------------------------------------------
# Pallas kernel: whole mixer hot path for one batch tile (batch on lanes).
# ---------------------------------------------------------------------------
def _qmix_kernel(
    scalars_ref,    # (2,) SMEM: [gate, b_v2]
    qs_ref,         # (NAQ, TB)
    st_ref,         # (S, TB)
    wcat_ref,       # (HYPER_OUT_PAD, S)
    bcat_ref,       # (HYPER_OUT_PAD, 1)
    wv2_ref,        # (E, 1)
    out_ref,        # (1, TB)
):
    qs = qs_ref[...].astype(jnp.float32)          # (NAQ, TB)
    st = st_ref[...].astype(jnp.float32)          # (S, TB)

    # One fused MXU call for all four state projections (was 4 separate,
    # column-starved matmuls). N = TB is lane-dense (multiple of 128).
    proj = (
        jnp.dot(wcat_ref[...], st, preferred_element_type=jnp.float32)
        + bcat_ref[...]                           # (HYPER_OUT_PAD, 1) lane-broadcast
    )                                             # (HYPER_OUT_PAD, TB)

    w1 = jnp.abs(proj[OFF_W1:OFF_B1, :])          # (NAQ*E, TB)  hyper_w_1
    b1 = proj[OFF_B1:OFF_WF, :]                   # (E, TB)      hyper_b_1
    w_final = jnp.abs(proj[OFF_WF:OFF_V1, :])     # (E, TB)      hyper_w_final
    v_h = jnp.maximum(proj[OFF_V1:HYPER_OUT, :], 0.0)  # (E, TB)  V hidden (ReLU)

    # bmm(agent_qs (B,1,NA), w1 (B,NA,E)) as a per-agent weighted sum over
    # sublane-aligned slices of `proj`.  (If VALU ever binds at large TB this
    # could be turned into one broadcast-multiply + grouped sublane reduce.)
    hidden_pre = b1
    for a in range(NAQ):
        hidden_pre = hidden_pre + (
            qs[a:a + 1, :] * w1[a * EMBED_DIM:(a + 1) * EMBED_DIM, :]
        )

    # ELU (alpha = 1).  Clamp the exp argument so the unselected branch stays
    # finite for large positive pre-activations.
    hidden = jnp.where(
        hidden_pre > 0.0,
        hidden_pre,
        jnp.exp(jnp.minimum(hidden_pre, 0.0)) - 1.0,
    )                                             # (E, TB)

    gate = scalars_ref[0]
    b_v2 = scalars_ref[1]

    # Second V layer (E -> 1): replace the N=1 matmul with a VPU multiply +
    # sublane reduce (MXU columns would be 1/128-1/256 utilized otherwise).
    v = jnp.sum(v_h * wv2_ref[...], axis=0, keepdims=True) + b_v2   # (1, TB)

    # bmm(hidden (B,1,E), w_final (B,E,1)) == column-wise dot -> sublane reduce.
    y = jnp.sum(hidden * w_final, axis=0, keepdims=True)            # (1, TB)
    if GATED:
        y = y * gate
    y = y + v
    if SKIP_CONNECTIONS:
        y = y + jnp.sum(qs, axis=0, keepdims=True)

    out_ref[...] = y.astype(out_ref.dtype)        # lane-dense (1, TB) store


# ---------------------------------------------------------------------------
# Parameter packing (done once, outside the per-call path)
# ---------------------------------------------------------------------------
def pack_params(params):
    """Fuse the four state-projection weights/biases and lift scalars."""
    wcat = jnp.concatenate(
        [params["w_w1"], params["w_b1"], params["w_wf"], params["w_v1"]], axis=1
    )                                               # (S, 352)
    wcat = jnp.pad(wcat, ((0, 0), (0, HYPER_OUT_PAD - HYPER_OUT)))
    bcat = jnp.concatenate(
        [params["b_w1"], params["b_b1"], params["b_wf"], params["b_v1"]], axis=1
    )                                               # (1, 352)
    bcat = jnp.pad(bcat, ((0, 0), (0, HYPER_OUT_PAD - HYPER_OUT)))
    return {
        "wcat_t": jnp.transpose(wcat),              # (384, S)
        "bcat": jnp.transpose(bcat),                # (384, 1)
        "w_v2": params["w_v2"],                     # (E, 1)
        "scalars": jnp.array(
            [params["gate"][0, 0], params["b_v2"][0, 0]], jnp.float32
        ),
    }


# ---------------------------------------------------------------------------
# Wrapper
# ---------------------------------------------------------------------------
@jax.jit
def qmix_forward(agent_qs, states, packed):
    """agent_qs: (bs, seq, NAQ), states: (bs, seq, STATE_DIM) -> (bs, seq, 1)."""
    bs, seq = agent_qs.shape[0], agent_qs.shape[1]
    b = bs * seq
    tb = min(MAX_TB, _round_up(b, 128))             # lane-aligned batch tile
    b_pad = _round_up(b, tb)
    grid = (b_pad // tb,)

    # Batch-on-lanes layout + zero padding of the batch tail.
    qs_t = jnp.transpose(agent_qs.reshape(b, NAQ).astype(jnp.float32))       # (NAQ, B)
    st_t = jnp.transpose(states.reshape(b, STATE_DIM).astype(jnp.float32))   # (S, B)
    qs_t = jnp.pad(qs_t, ((0, 0), (0, b_pad - b)))
    st_t = jnp.pad(st_t, ((0, 0), (0, b_pad - b)))

    out = pl.pallas_call(
        _qmix_kernel,
        out_shape=jax.ShapeDtypeStruct((1, b_pad), jnp.float32),
        grid_spec=pltpu.PrefetchScalarGridSpec(
            num_scalar_prefetch=0,
            grid=grid,
            in_specs=[
                # true scalars live in SMEM (no (1,1) VMEM tiles / vld slots)
                pl.BlockSpec(memory_space=pltpu.MemorySpace.SMEM),
                pl.BlockSpec((NAQ, tb), lambda i: (0, i)),
                pl.BlockSpec((STATE_DIM, tb), lambda i: (0, i)),
                # weights: constant index map -> resident across grid steps
                pl.BlockSpec((HYPER_OUT_PAD, STATE_DIM), lambda i: (0, 0)),
                pl.BlockSpec((HYPER_OUT_PAD, 1), lambda i: (0, 0)),
                pl.BlockSpec((EMBED_DIM, 1), lambda i: (0, 0)),
            ],
            out_specs=pl.BlockSpec((1, tb), lambda i: (0, i)),
        ),
        compiler_params=pltpu.CompilerParams(
            dimension_semantics=("parallel",),
        ),
    )(packed["scalars"], qs_t, st_t, packed["wcat_t"], packed["bcat"], packed["w_v2"])

    return out[0, :b].reshape(bs, seq, 1)


# ---------------------------------------------------------------------------
# Pure-JAX reference (mirrors the PyTorch forward exactly, unpacked params)
# ---------------------------------------------------------------------------
def qmix_reference(agent_qs, states, params):
    bs = agent_qs.shape[0]
    st = states.reshape(-1, STATE_DIM).astype(jnp.float32)
    qs = agent_qs.reshape(-1, 1, NAQ).astype(jnp.float32)

    w1 = jnp.abs(st @ params["w_w1"] + params["b_w1"]).reshape(-1, NAQ, EMBED_DIM)
    b1 = (st @ params["w_b1"] + params["b_b1"]).reshape(-1, 1, EMBED_DIM)
    hidden = jax.nn.elu(jnp.einsum("bik,bkj->bij", qs, w1) + b1)

    w_final = jnp.abs(st @ params["w_wf"] + params["b_wf"]).reshape(-1, EMBED_DIM, 1)
    v_h = jax.nn.relu(st @ params["w_v1"] + params["b_v1"])
    v = (v_h @ params["w_v2"] + params["b_v2"]).reshape(-1, 1, 1)

    s = jnp.sum(qs, axis=2, keepdims=True) if SKIP_CONNECTIONS else 0.0
    y = jnp.einsum("bik,bkj->bij", hidden, w_final)
    if GATED:
        y = y * params["gate"][0, 0]
    y = y + v + s
    return y.reshape(bs, -1, 1)


# ---------------------------------------------------------------------------
# Deterministic parameter init (synthetic; no checkpoint loading)
# ---------------------------------------------------------------------------
def make_params(key):
    keys = jax.random.split(key, 10)
    scale = 0.1

    def lin(k, fan_in, fan_out):
        kw, kb = jax.random.split(k)
        w = jax.random.normal(kw, (fan_in, fan_out), jnp.float32) * scale
        b = jax.random.normal(kb, (1, fan_out), jnp.float32) * scale
        return w, b

    w_w1, b_w1 = lin(keys[0], STATE_DIM, EMBED_DIM * NAQ)
    w_b1, b_b1 = lin(keys[1], STATE_DIM, EMBED_DIM)
    w_wf, b_wf = lin(keys[2], STATE_DIM, EMBED_DIM)
    w_v1, b_v1 = lin(keys[3], STATE_DIM, EMBED_DIM)
    w_v2, b_v2 = lin(keys[4], EMBED_DIM, 1)
    gate = jnp.full((1, 1), 0.5, jnp.float32)   # nn.Parameter(ones * 0.5)

    return {
        "w_w1": w_w1, "b_w1": b_w1,
        "w_b1": w_b1, "b_b1": b_b1,
        "w_wf": w_wf, "b_wf": b_wf,
        "w_v1": w_v1, "b_v1": b_v1,
        "w_v2": w_v2, "b_v2": b_v2,
        "gate": gate,
    }


if __name__ == "__main__":
    key = jax.random.PRNGKey(0)
    k_params, k_qs, k_st = jax.random.split(key, 3)

    params = make_params(k_params)
    packed = pack_params(params)          # fuse weights once, not per call
    agent_qs = jax.random.normal(k_qs, (BS, SEQ, NAQ), jnp.float32)
    states = jax.random.normal(k_st, (BS, SEQ, STATE_DIM), jnp.float32)

    q_tot = qmix_forward(agent_qs, states, packed)
    q_tot = jax.block_until_ready(q_tot)

    q_ref = qmix_reference(agent_qs, states, params)
    assert q_tot.shape == (BS, SEQ, 1), q_tot.shape
    assert jnp.allclose(q_tot, q_ref, atol=1e-4, rtol=1e-4), (
        "mismatch", float(jnp.max(jnp.abs(q_tot - q_ref))))

    print("KERNEL_OK")
</pallas_src>

<mosaic_0001>
module attributes {stable_mosaic.version = 11 : i64} {
  func.func @_qmix_kernel(%arg0: i32, %arg1: memref<2xf32, #tpu.memory_space<smem>>, %arg2: memref<8x128xf32, #tpu.memory_space<vmem>>, %arg3: memref<32x128xf32, #tpu.memory_space<vmem>>, %arg4: memref<384x32xf32, #tpu.memory_space<vmem>>, %arg5: memref<384x1xf32, #tpu.memory_space<vmem>>, %arg6: memref<32x1xf32, #tpu.memory_space<vmem>>, %arg7: memref<1x128xf32, #tpu.memory_space<vmem>>) attributes {dimension_semantics = [#tpu.dimension_semantics<parallel>], iteration_bounds = array<i64: 1>, scalar_prefetch = 0 : i64, scratch_operands = 0 : i64, tpu.core_type = #tpu.core_type<tc>, window_params = [{transform_indices = @transform_0, window_bounds = array<i64: 2>}, {transform_indices = @transform_1, window_bounds = array<i64: 8, 128>}, {transform_indices = @transform_2, window_bounds = array<i64: 32, 128>}, {pipeline_mode = #tpu.pipeline_mode<synchronous>, transform_indices = @transform_3, window_bounds = array<i64: 384, 32>}, {pipeline_mode = #tpu.pipeline_mode<synchronous>, transform_indices = @transform_4, window_bounds = array<i64: 384, 1>}, {pipeline_mode = #tpu.pipeline_mode<synchronous>, transform_indices = @transform_5, window_bounds = array<i64: 32, 1>}, {transform_indices = @transform_6, window_bounds = array<i64: 1, 128>}]} {
    %c0 = arith.constant 0 : index
    %c0_0 = arith.constant 0 : index
    %0 = vector.load %arg2[%c0, %c0_0] : memref<8x128xf32, #tpu.memory_space<vmem>>, vector<8x128xf32>
    %c0_1 = arith.constant 0 : index
    %c0_2 = arith.constant 0 : index
    %1 = vector.load %arg3[%c0_1, %c0_2] : memref<32x128xf32, #tpu.memory_space<vmem>>, vector<32x128xf32>
    %c0_3 = arith.constant 0 : index
    %c0_4 = arith.constant 0 : index
    %2 = vector.load %arg4[%c0_3, %c0_4] : memref<384x32xf32, #tpu.memory_space<vmem>>, vector<384x32xf32>
    %cst = arith.constant dense<0.000000e+00> : vector<384x128xf32>
    %3 = tpu.matmul %2, %1, %cst {dimension_numbers = #tpu.dot_dimension_numbers<[1], [0], [0], [1], [0, 0, 1, 1], [], []>} : vector<384x32xf32>, vector<32x128xf32>, vector<384x128xf32> -> vector<384x128xf32>
    %c0_5 = arith.constant 0 : index
    %c0_6 = arith.constant 0 : index
    %4 = vector.load %arg5[%c0_5, %c0_6] : memref<384x1xf32, #tpu.memory_space<vmem>>, vector<384x1xf32>
    %5 = vector.broadcast %4 : vector<384x1xf32> to vector<384x128xf32>
    %6 = arith.addf %3, %5 : vector<384x128xf32>
    %7 = vector.extract_strided_slice %6 {offsets = [0, 0], sizes = [256, 128], strides = [1, 1]} : vector<384x128xf32> to vector<256x128xf32>
    %8 = math.absf %7 : vector<256x128xf32>
    %9 = vector.extract_strided_slice %6 {offsets = [256, 0], sizes = [32, 128], strides = [1, 1]} : vector<384x128xf32> to vector<32x128xf32>
    %10 = vector.extract_strided_slice %6 {offsets = [288, 0], sizes = [32, 128], strides = [1, 1]} : vector<384x128xf32> to vector<32x128xf32>
    %11 = math.absf %10 : vector<32x128xf32>
    %12 = vector.extract_strided_slice %6 {offsets = [320, 0], sizes = [32, 128], strides = [1, 1]} : vector<384x128xf32> to vector<32x128xf32>
    %cst_7 = arith.constant 0.000000e+00 : f32
    %13 = vector.broadcast %cst_7 : f32 to vector<32x128xf32>
    %14 = arith.maximumf %12, %13 : vector<32x128xf32>
    %15 = vector.extract_strided_slice %0 {offsets = [0, 0], sizes = [1, 128], strides = [1, 1]} : vector<8x128xf32> to vector<1x128xf32>
    %16 = vector.extract_strided_slice %8 {offsets = [0, 0], sizes = [32, 128], strides = [1, 1]} : vector<256x128xf32> to vector<32x128xf32>
    %17 = vector.broadcast %15 : vector<1x128xf32> to vector<32x128xf32>
    %18 = arith.mulf %17, %16 : vector<32x128xf32>
    %19 = arith.addf %9, %18 : vector<32x128xf32>
    %20 = vector.extract_strided_slice %0 {offsets = [1, 0], sizes = [1, 128], strides = [1, 1]} : vector<8x128xf32> to vector<1x128xf32>
    %21 = vector.extract_strided_slice %8 {offsets = [32, 0], sizes = [32, 128], strides = [1, 1]} : vector<256x128xf32> to vector<32x128xf32>
    %22 = vector.broadcast %20 : vector<1x128xf32> to vector<32x128xf32>
    %23 = arith.mulf %22, %21 : vector<32x128xf32>
    %24 = arith.addf %19, %23 : vector<32x128xf32>
    %25 = vector.extract_strided_slice %0 {offsets = [2, 0], sizes = [1, 128], strides = [1, 1]} : vector<8x128xf32> to vector<1x128xf32>
    %26 = vector.extract_strided_slice %8 {offsets = [64, 0], sizes = [32, 128], strides = [1, 1]} : vector<256x128xf32> to vector<32x128xf32>
    %27 = vector.broadcast %25 : vector<1x128xf32> to vector<32x128xf32>
    %28 = arith.mulf %27, %26 : vector<32x128xf32>
    %29 = arith.addf %24, %28 : vector<32x128xf32>
    %30 = vector.extract_strided_slice %0 {offsets = [3, 0], sizes = [1, 128], strides = [1, 1]} : vector<8x128xf32> to vector<1x128xf32>
    %31 = vector.extract_strided_slice %8 {offsets = [96, 0], sizes = [32, 128], strides = [1, 1]} : vector<256x128xf32> to vector<32x128xf32>
    %32 = vector.broadcast %30 : vector<1x128xf32> to vector<32x128xf32>
    %33 = arith.mulf %32, %31 : vector<32x128xf32>
    %34 = arith.addf %29, %33 : vector<32x128xf32>
    %35 = vector.extract_strided_slice %0 {offsets = [4, 0], sizes = [1, 128], strides = [1, 1]} : vector<8x128xf32> to vector<1x128xf32>
    %36 = vector.extract_strided_slice %8 {offsets = [128, 0], sizes = [32, 128], strides = [1, 1]} : vector<256x128xf32> to vector<32x128xf32>
    %37 = vector.broadcast %35 : vector<1x128xf32> to vector<32x128xf32>
    %38 = arith.mulf %37, %36 : vector<32x128xf32>
    %39 = arith.addf %34, %38 : vector<32x128xf32>
    %40 = vector.extract_strided_slice %0 {offsets = [5, 0], sizes = [1, 128], strides = [1, 1]} : vector<8x128xf32> to vector<1x128xf32>
    %41 = vector.extract_strided_slice %8 {offsets = [160, 0], sizes = [32, 128], strides = [1, 1]} : vector<256x128xf32> to vector<32x128xf32>
    %42 = vector.broadcast %40 : vector<1x128xf32> to vector<32x128xf32>
    %43 = arith.mulf %42, %41 : vector<32x128xf32>
    %44 = arith.addf %39, %43 : vector<32x128xf32>
    %45 = vector.extract_strided_slice %0 {offsets = [6, 0], sizes = [1, 128], strides = [1, 1]} : vector<8x128xf32> to vector<1x128xf32>
    %46 = vector.extract_strided_slice %8 {offsets = [192, 0], sizes = [32, 128], strides = [1, 1]} : vector<256x128xf32> to vector<32x128xf32>
    %47 = vector.broadcast %45 : vector<1x128xf32> to vector<32x128xf32>
    %48 = arith.mulf %47, %46 : vector<32x128xf32>
    %49 = arith.addf %44, %48 : vector<32x128xf32>
    %50 = vector.extract_strided_slice %0 {offsets = [7, 0], sizes = [1, 128], strides = [1, 1]} : vector<8x128xf32> to vector<1x128xf32>
    %51 = vector.extract_strided_slice %8 {offsets = [224, 0], sizes = [32, 128], strides = [1, 1]} : vector<256x128xf32> to vector<32x128xf32>
    %52 = vector.broadcast %50 : vector<1x128xf32> to vector<32x128xf32>
    %53 = arith.mulf %52, %51 : vector<32x128xf32>
    %54 = arith.addf %49, %53 : vector<32x128xf32>
    %cst_8 = arith.constant 0.000000e+00 : f32
    %55 = vector.broadcast %cst_8 : f32 to vector<32x128xf32>
    %56 = arith.cmpf ogt, %54, %55 : vector<32x128xf32>
    %cst_9 = arith.constant 0.000000e+00 : f32
    %57 = vector.broadcast %cst_9 : f32 to vector<32x128xf32>
    %58 = arith.minimumf %54, %57 : vector<32x128xf32>
    %59 = math.exp %58 : vector<32x128xf32>
    %cst_10 = arith.constant 1.000000e+00 : f32
    %60 = vector.broadcast %cst_10 : f32 to vector<32x128xf32>
    %61 = arith.subf %59, %60 : vector<32x128xf32>
    %62 = arith.select %56, %54, %61 : vector<32x128xi1>, vector<32x128xf32>
    %c0_11 = arith.constant 0 : index
    %63 = memref.load %arg1[%c0_11] : memref<2xf32, #tpu.memory_space<smem>>
    %c1 = arith.constant 1 : index
    %64 = memref.load %arg1[%c1] : memref<2xf32, #tpu.memory_space<smem>>
    %c0_12 = arith.constant 0 : index
    %c0_13 = arith.constant 0 : index
    %65 = vector.load %arg6[%c0_12, %c0_13] : memref<32x1xf32, #tpu.memory_space<vmem>>, vector<32x1xf32>
    %66 = vector.broadcast %65 : vector<32x1xf32> to vector<32x128xf32>
    %67 = arith.mulf %14, %66 : vector<32x128xf32>
    %cst_14 = arith.constant dense<0.000000e+00> : vector<128xf32>
    %68 = vector.multi_reduction <add>, %67, %cst_14 [0] : vector<32x128xf32> to vector<128xf32>
    %69 = vector.shape_cast %68 : vector<128xf32> to vector<1x128xf32>
    %70 = vector.broadcast %64 : f32 to vector<1x128xf32>
    %71 = arith.addf %69, %70 : vector<1x128xf32>
    %72 = arith.mulf %62, %11 : vector<32x128xf32>
    %cst_15 = arith.constant dense<0.000000e+00> : vector<128xf32>
    %73 = vector.multi_reduction <add>, %72, %cst_15 [0] : vector<32x128xf32> to vector<128xf32>
    %74 = vector.shape_cast %73 : vector<128xf32> to vector<1x128xf32>
    %75 = vector.broadcast %63 : f32 to vector<1x128xf32>
    %76 = arith.mulf %74, %75 : vector<1x128xf32>
    %77 = arith.addf %76, %71 : vector<1x128xf32>
    %cst_16 = arith.constant dense<0.000000e+00> : vector<128xf32>
    %78 = vector.multi_reduction <add>, %0, %cst_16 [0] : vector<8x128xf32> to vector<128xf32>
    %79 = vector.shape_cast %78 : vector<128xf32> to vector<1x128xf32>
    %80 = arith.addf %77, %79 : vector<1x128xf32>
    %c0_17 = arith.constant 0 : index
    %c0_18 = arith.constant 0 : index
    %81 = vector.load %arg7[%c0_17, %c0_18] : memref<1x128xf32, #tpu.memory_space<vmem>>, vector<1x128xf32>
    tpu.vector_store %arg7[%c0_17, %c0_18], %80 {strides = array<i32>} : memref<1x128xf32, #tpu.memory_space<vmem>>, vector<1x128xf32>,
    return
  }
  func.func @transform_0(%arg0: i32) -> i32 {
    %c0_i32 = arith.constant 0 : i32
    %c0_i32_0 = arith.constant 0 : i32
    return %c0_i32 : i32
  }
  func.func @transform_1(%arg0: i32) -> (i32, i32) {
    %c0_i32 = arith.constant 0 : i32
    %c0_i32_0 = arith.constant 0 : i32
    return %c0_i32, %arg0 : i32, i32
  }
  func.func @transform_2(%arg0: i32) -> (i32, i32) {
    %c0_i32 = arith.constant 0 : i32
    %c0_i32_0 = arith.constant 0 : i32
    return %c0_i32, %arg0 : i32, i32
  }
  func.func @transform_3(%arg0: i32) -> (i32, i32) {
    %c0_i32 = arith.constant 0 : i32
    %c0_i32_0 = arith.constant 0 : i32
    %c0_i32_1 = arith.constant 0 : i32
    return %c0_i32, %c0_i32_0 : i32, i32
  }
  func.func @transform_4(%arg0: i32) -> (i32, i32) {
    %c0_i32 = arith.constant 0 : i32
    %c0_i32_0 = arith.constant 0 : i32
    %c0_i32_1 = arith.constant 0 : i32
    return %c0_i32, %c0_i32_0 : i32, i32
  }
  func.func @transform_5(%arg0: i32) -> (i32, i32) {
    %c0_i32 = arith.constant 0 : i32
    %c0_i32_0 = arith.constant 0 : i32
    %c0_i32_1 = arith.constant 0 : i32
    return %c0_i32, %c0_i32_0 : i32, i32
  }
  func.func @transform_6(%arg0: i32) -> (i32, i32) {
    %c0_i32 = arith.constant 0 : i32
    %c0_i32_0 = arith.constant 0 : i32
    return %c0_i32, %arg0 : i32, i32
  }
}

</mosaic_0001>

<bundles_post_ra>
// kernel: squeeze.1
= control target key start
LH: loop header
LB: loop body
LE: loop exit
PB: predicated region body
PF: predicated region fallthrough
CT: control target
= control target key end

     0   :  { %s77_s0 = inlined_call_operand.vmem [shape: f32[8], index: 0, kind: input, shape index: {}]   ;;  %s78_s1 = inlined_call_operand.hbm [shape: f32[2,4,1], index: 1, kind: output, shape index: {}]  }
   0x1   :  { %v6_v0 = vld [vmem:[%s77_s0] sm:$0x1] }
   0x2   :  { %2 = vsyncpa [#allocation1], 0  ;;  %7 = vst [vmem:[#allocation3] sm:$0x1] %v6_v0  ;;  %vm9_vm0 = vcmask 31744   ;;  %s59_s0 = smov 124  }
   0x3   :  { %s60_s8 = smov [#allocation0]  }
   0x4   :  { %s29_s9 = sshll.u32 %s60_s8, 4  ;;  %s30_s9 = int_to_ptr.vmem [resolvable:$true] %s29_s9 }
   0x5   :  { %s37_s10 = scalar_lea.vmem %s30_s9, 32  ;;  %p42_p1 = scmp.lt.s32.totalorder %s30_s9, %s30_s9 }
   0x6   :  { %p38_p0 = scmp.ne.s32.totalorder %s30_s9, %s37_s10  ;;  %p43_p2 = scmp.lt.s32.totalorder %s37_s10, %s37_s10 }
   0x8   :  { %p44_p3 = por %p43_p2, %p42_p1 }
   0x9   :  { %v11_v1 = vld [vmem:[#allocation3] sm:$0x1]  }
   0xa   :  { %v8_v2 = vld [vmem:[#allocation3] sm:$0x1]   ;;  %12 = vrot.lane.b32.xlu0 %v11_v1, %s59_s0  ;;  %p45_p4 = pnand %p44_p3, %p38_p0 }
   0xb   :  { %10 = vst.msk [vmem:[#allocation2] sm:$0x1] %vm9_vm0, %v8_v2  }
  0x7c   :  { %v13_v3 = vpop.permute.xlu0 %12  }
  0x7d   :  { %16 = vst.msk [vmem:[#allocation2 + $0x1] sm:$0x1] %vm9_vm0, %v13_v3  }
  0x84   :  { %v21_v4 = vld [vmem:[#allocation2] sm:$0x3] }
  0x85   :  { %24 = vst [vmem:[#allocation0] sm:$0x3] %v21_v4 }
  0x86   :  { %48 = shalt.err (!%p45_p4)
}
  0x87   :  { %32 = dma.vmem_to_hbm [thread:$0]  %s30_s9, 32, %s78_s1, [#allocation1]  }
  0x88   :  { %57 = dma.done.wait [#allocation1], 32  }
  0x89   :  { %58 = vsyncadd [#allocation1], 4294967264 }
  0x8a   :  { %34 = vsyncpa [#allocation1], 1 }

// kernel: qmix_forward.1
= control target key start
LH: loop header
LB: loop body
LE: loop exit
PB: predicated region body
PF: predicated region fallthrough
CT: control target
= control target key end

     0   :  { %11 = vsyncpa [#allocation3], 0  ;;  %s1883_s0 = inlined_call_operand.vmem [shape: f32[2], index: 0, kind: input, shape index: {}]   ;;  %s1884_s1 = inlined_call_operand.vmem [shape: f32[8,128], index: 1, kind: input, shape index: {}]   ;;  %s1885_s2 = inlined_call_operand.vmem [shape: f32[32,128], index: 2, kind: input, shape index: {}]   ;;  %s1886_s3 = inlined_call_operand.vmem [shape: f32[384,32], index: 3, kind: input, shape index: {}]   ;;  %s1887_s4 = inlined_call_operand.vmem [shape: f32[384,1], index: 4, kind: input, shape index: {}]   ;;  %s1888_s5 = inlined_call_operand.vmem [shape: f32[32,1], index: 5, kind: input, shape index: {}]   ;;  %s1889_s6 = inlined_call_operand.vmem [shape: f32[1,128], index: 6, kind: output, shape index: {}]  }
   0x1   :  { %s18_s23 = sshll.u32 %s1883_s0, 4  ;;  %s19_s23 = int_to_ptr.vmem [resolvable:$true] %s18_s23 }
   0x2   :  { %s1254_s24 = scalar_lea.vmem %s19_s23, 16  ;;  %p1259_p1 = scmp.lt.s32.totalorder %s19_s23, %s19_s23 }
   0x3   :  { %p1255_p0 = scmp.ne.s32.totalorder %s19_s23, %s1254_s24  ;;  %p1260_p2 = scmp.lt.s32.totalorder %s1254_s24, %s1254_s24 }
   0x5   :  { %p1261_p3 = por %p1260_p2, %p1259_p1 }
   0x7   :  { %p1262_p4 = pnand %p1261_p3, %p1255_p0 }
   0x9   :  { %1265 = shalt.err (!%p1262_p4)
}
   0xa   :  { %s1268_s25 = smov [#allocation2]  }
   0xb   :  { %21 = dma.vmem_to_smem %s19_s23, 16, %s1268_s25, [#allocation3]  }
   0xc   :  { %1266 = dma.done.wait [#allocation3], 16  }
   0xd   :  { %1267 = vsyncadd [#allocation3], 4294967280 }
   0xe   :  { %35 = sfence }
   0xf   :  { %v40_v0 = vld [vmem:[%s1885_s2 + $0x18] sm:$0xff]  ;;  %v91_v1 = vld [vmem:[%s1887_s4 + $0x10] sm:$0xff]  ;;  %v89_v2 = vld [vmem:[%s1887_s4] sm:$0xff]  ;;  %v1269_v3 = vmov 0   ;;  %vm373_vm0 = vcmask 261120   ;;  %s979_s17 = sld [smem:[#allocation2]] }
  0x10   :  { %1245 = vset.pattern.permute.xlu1 %v1269_v3  ;;  %1244 = vset.pattern.permute.xlu0 %v1269_v3  ;;  %v39_v4 = vld [vmem:[%s1885_s2 + $0x10] sm:$0xff]  ;;  %v38_v5 = vld [vmem:[%s1885_s2 + $0x8] sm:$0xff]  ;;  %v92_v6 = vld [vmem:[%s1887_s4 + $0x18] sm:$0xff] }
  0x11   :  { %1154 = vmatprep.subr.mxu0 %v40_v0  ;;  %1234 = vmatprep.subr.mxu1 %v40_v0  ;;  %v90_v7 = vld [vmem:[%s1887_s4 + $0x8] sm:$0xff]  ;;  %v37_v8 = vld [vmem:[%s1885_s2] sm:$0xff]  ;;  %v43_v15 = vld [vmem:[%s1886_s3 + $0x10] sm:$0xff] }
  0x12   :  { %149 = vperm.xlu1 %1245, %v91_v1   ;;  %139 = vperm.xlu0 %1244, %v89_v2   ;;  %v41_v9 = vld [vmem:[%s1886_s3] sm:$0xff]  ;;  %v42_v11 = vld [vmem:[%s1886_s3 + $0x8] sm:$0xff]  ;;  %v67_v16 = vld [vmem:[%s1886_s3 + $0xd0] sm:$0xff] }
  0x13   :  { %1155 = vmatpush3.msra.mxu0 %v40_v0  ;;  %1238 = vmatpush3.msra.mxu1 %v40_v0  ;;  %v65_v10 = vld [vmem:[%s1886_s3 + $0xc0] sm:$0xff]  ;;  %v66_v12 = vld [vmem:[%s1886_s3 + $0xc8] sm:$0xff]  ;;  %v44_v17 = vld [vmem:[%s1886_s3 + $0x18] sm:$0xff] }
  0x14   :  { %1156 = vmatprep.subr.mxu0 %v39_v4  ;;  %1235 = vmatprep.subr.mxu1 %v39_v4  ;;  %v94_v13 = vld [vmem:[%s1887_s4 + $0x28] sm:$0xff]  ;;  %v93_v14 = vld [vmem:[%s1887_s4 + $0x20] sm:$0xff]  ;;  %v68_v18 = vld [vmem:[%s1886_s3 + $0xd8] sm:$0xff] }
  0x15   :  { %1157 = vmatpush3.msra.mxu0 %v39_v4  ;;  %1239 = vmatpush3.msra.mxu1 %v39_v4  ;;  %v96_v19 = vld [vmem:[%s1887_s4 + $0x38] sm:$0xff]  ;;  %v95_v20 = vld [vmem:[%s1887_s4 + $0x30] sm:$0xff]  ;;  %v45_v21 = vld [vmem:[%s1886_s3 + $0x20] sm:$0xff] }
  0x16   :  { %1158 = vmatprep.subr.mxu0 %v38_v5  ;;  %1236 = vmatprep.subr.mxu1 %v38_v5  ;;  %v69_v22 = vld [vmem:[%s1886_s3 + $0xe0] sm:$0xff]  ;;  %v46_v23 = vld [vmem:[%s1886_s3 + $0x28] sm:$0xff]  ;;  %v47_v27 = vld [vmem:[%s1886_s3 + $0x30] sm:$0xff] }
  0x17   :  { %154 = vperm.xlu1 %1245, %v92_v6   ;;  %144 = vperm.xlu0 %1244, %v90_v7   ;;  %v70_v24 = vld [vmem:[%s1886_s3 + $0xe8] sm:$0xff]  ;;  %v97_v26 = vld [vmem:[%s1887_s4 + $0x40] sm:$0xff]  ;;  %v71_v28 = vld [vmem:[%s1886_s3 + $0xf0] sm:$0xff] }
  0x18   :  { %1159 = vmatpush3.msra.mxu0 %v38_v5  ;;  %1240 = vmatpush3.msra.mxu1 %v38_v5  ;;  %v98_v25 = vld [vmem:[%s1887_s4 + $0x48] sm:$0xff]  ;;  %v48_v29 = vld [vmem:[%s1886_s3 + $0x38] sm:$0xff]  ;;  %v99_v32 = vld [vmem:[%s1887_s4 + $0x50] sm:$0xff] }
  0x19   :  { %1160 = vmatprep.subr.mxu0 %v37_v8  ;;  %1237 = vmatprep.subr.mxu1 %v37_v8  ;;  %v72_v30 = vld [vmem:[%s1886_s3 + $0xf8] sm:$0xff]  ;;  %v49_v33 = vld [vmem:[%s1886_s3 + $0x40] sm:$0xff]  ;;  %v50_v35 = vld [vmem:[%s1886_s3 + $0x48] sm:$0xff] }
  0x1a   :  { %1161 = vmatpush3.msra.mxu0 %v37_v8  ;;  %1241 = vmatpush3.msra.mxu1 %v37_v8  ;;  %v100_v31 = vld [vmem:[%s1887_s4 + $0x58] sm:$0xff]  ;;  %v73_v34 = vld [vmem:[%s1886_s3 + $0x100] sm:$0xff]  ;;  %v74_v36 = vld [vmem:[%s1886_s3 + $0x108] sm:$0xff] }
  0x1b   :  { %1162 = vmatprep.mubr.msk.f32.mxu0 %vm373_vm0, %v41_v9  ;;  %1198 = vmatprep.mubr.msk.f32.mxu1 %vm373_vm0, %v65_v10  ;;  %v102_v37 = vld [vmem:[%s1887_s4 + $0x68] sm:$0xff]  ;;  %v101_v38 = vld [vmem:[%s1887_s4 + $0x60] sm:$0xff]  ;;  %v51_v39 = vld [vmem:[%s1886_s3 + $0x50] sm:$0xff] }
  0x1c   :  { %1163 = vmatmul.mubr.msk.f32.vlgmr.msra.gmra.mxu0 %vm373_vm0, %v42_v11  ;;  %1199 = vmatmul.mubr.msk.f32.vlgmr.msra.gmra.mxu1 %vm373_vm0, %v66_v12  ;;  %v75_v40 = vld [vmem:[%s1886_s3 + $0x110] sm:$0xff]  ;;  %v52_v41 = vld [vmem:[%s1886_s3 + $0x58] sm:$0xff]  ;;  %v53_v45 = vld [vmem:[%s1886_s3 + $0x60] sm:$0xff] }
  0x1d   :  { %164 = vperm.xlu1 %1245, %v94_v13   ;;  %159 = vperm.xlu0 %1244, %v93_v14   ;;  %v76_v42 = vld [vmem:[%s1886_s3 + $0x118] sm:$0xff]  ;;  %v103_v44 = vld [vmem:[%s1887_s4 + $0x70] sm:$0xff]  ;;  %v77_v46 = vld [vmem:[%s1886_s3 + $0x120] sm:$0xff] }
  0x1e   :  { %1165 = vmatprep.mubr.msk.f32.mxu0 %vm373_vm0, %v43_v15  ;;  %1201 = vmatprep.mubr.msk.f32.mxu1 %vm373_vm0, %v67_v16  ;;  %v104_v43 = vld [vmem:[%s1887_s4 + $0x78] sm:$0xff]  ;;  %v54_v47 = vld [vmem:[%s1886_s3 + $0x68] sm:$0xff]  ;;  %v121_v50 = vld [vmem:[%s1887_s4 + $0x100] sm:$0xff] }
  0x1f   :  { %v78_v48 = vld [vmem:[%s1886_s3 + $0x128] sm:$0xff]  ;;  %v55_v51 = vld [vmem:[%s1886_s3 + $0x70] sm:$0xff]  ;;  %v56_v53 = vld [vmem:[%s1886_s3 + $0x78] sm:$0xff] }
  0x20   :  { %1166 = vmatmul.mubr.msk.f32.gmra.mxu0 %vm373_vm0, %v44_v17  ;;  %1202 = vmatmul.mubr.msk.f32.gmra.mxu1 %vm373_vm0, %v68_v18  ;;  %v122_v49 = vld [vmem:[%s1887_s4 + $0x108] sm:$0xff]  ;;  %v79_v52 = vld [vmem:[%s1886_s3 + $0x130] sm:$0xff]  ;;  %v80_v54 = vld [vmem:[%s1886_s3 + $0x138] sm:$0xff] }
  0x21   :  { %174 = vperm.xlu1 %1245, %v96_v19   ;;  %169 = vperm.xlu0 %1244, %v95_v20   ;;  %v105_v55 = vld [vmem:[%s1887_s4 + $0x80] sm:$0xff]  ;;  %v123_v56 = vld [vmem:[%s1887_s4 + $0x110] sm:$0xff]  ;;  %v58_v59 = vld [vmem:[%s1886_s3 + $0x88] sm:$0xff] }
  0x22   :  { %1168 = vmatprep.mubr.msk.f32.mxu0 %vm373_vm0, %v45_v21  ;;  %1204 = vmatprep.mubr.msk.f32.mxu1 %vm373_vm0, %v69_v22  ;;  %v57_v57 = vld [vmem:[%s1886_s3 + $0x80] sm:$0xff]  ;;  %v82_v60 = vld [vmem:[%s1886_s3 + $0x148] sm:$0xff]  ;;  %v124_v61 = vld [vmem:[%s1887_s4 + $0x118] sm:$0xff] }
  0x23   :  { %v81_v58 = vld [vmem:[%s1886_s3 + $0x140] sm:$0xff]  ;;  %v106_v62 = vld [vmem:[%s1887_s4 + $0x88] sm:$0xff]  ;;  %v59_v63 = vld [vmem:[%s1886_s3 + $0x90] sm:$0xff] }
  0x24   :  { %1169 = vmatmul.mubr.msk.f32.gmra.mxu0 %vm373_vm0, %v46_v23  ;;  %1205 = vmatmul.mubr.msk.f32.gmra.mxu1 %vm373_vm0, %v70_v24  ;;  %v83_v0 = vld [vmem:[%s1886_s3 + $0x150] sm:$0xff]  ;;  %v60_v1 = vld [vmem:[%s1886_s3 + $0x98] sm:$0xff]  ;;  %v109_v3 = vld [vmem:[%s1887_s4 + $0xa0] sm:$0xff] }
  0x25   :  { %184 = vperm.xlu1 %1245, %v98_v25   ;;  %179 = vperm.xlu0 %1244, %v97_v26   ;;  %v84_v2 = vld [vmem:[%s1886_s3 + $0x158] sm:$0xff]  ;;  %v107_v4 = vld [vmem:[%s1887_s4 + $0x90] sm:$0xff]  ;;  %v61_v5 = vld [vmem:[%s1886_s3 + $0xa0] sm:$0xff] }
  0x26   :  { %1171 = vmatprep.mubr.msk.f32.mxu0 %vm373_vm0, %v47_v27  ;;  %1207 = vmatprep.mubr.msk.f32.mxu1 %vm373_vm0, %v71_v28  ;;  %v85_v6 = vld [vmem:[%s1886_s3 + $0x160] sm:$0xff]  ;;  %v62_v7 = vld [vmem:[%s1886_s3 + $0xa8] sm:$0xff]  ;;  %v108_v9 = vld [vmem:[%s1887_s4 + $0x98] sm:$0xff] }
  0x27   :  { %v86_v8 = vld [vmem:[%s1886_s3 + $0x168] sm:$0xff]  ;;  %v63_v11 = vld [vmem:[%s1886_s3 + $0xb0] sm:$0xff]  ;;  %v64_v13 = vld [vmem:[%s1886_s3 + $0xb8] sm:$0xff] }
  0x28   :  { %1172 = vmatmul.mubr.msk.f32.gmra.mxu0 %vm373_vm0, %v48_v29  ;;  %1208 = vmatmul.mubr.msk.f32.gmra.mxu1 %vm373_vm0, %v72_v30  ;;  %v110_v10 = vld [vmem:[%s1887_s4 + $0xa8] sm:$0xff]  ;;  %v87_v12 = vld [vmem:[%s1886_s3 + $0x170] sm:$0xff]  ;;  %v88_v14 = vld [vmem:[%s1886_s3 + $0x178] sm:$0xff] }
  0x29   :  { %194 = vperm.xlu1 %1245, %v100_v31   ;;  %189 = vperm.xlu0 %1244, %v99_v32   ;;  %v113_v15 = vld [vmem:[%s1887_s4 + $0xc0] sm:$0xff]  ;;  %v111_v16 = vld [vmem:[%s1887_s4 + $0xb0] sm:$0xff]  ;;  %v112_v17 = vld [vmem:[%s1887_s4 + $0xb8] sm:$0xff] }
  0x2a   :  { %1174 = vmatprep.mubr.msk.f32.mxu0 %vm373_vm0, %v49_v33  ;;  %1210 = vmatprep.mubr.msk.f32.mxu1 %vm373_vm0, %v73_v34  ;;  %v114_v18 = vld [vmem:[%s1887_s4 + $0xc8] sm:$0xff]  ;;  %v117_v19 = vld [vmem:[%s1887_s4 + $0xe0] sm:$0xff]  ;;  %v115_v20 = vld [vmem:[%s1887_s4 + $0xd0] sm:$0xff] }
  0x2b   :  { %v116_v21 = vld [vmem:[%s1887_s4 + $0xd8] sm:$0xff]  ;;  %v118_v22 = vld [vmem:[%s1887_s4 + $0xe8] sm:$0xff]  ;;  %v119_v24 = vld [vmem:[%s1887_s4 + $0xf0] sm:$0xff] }
  0x2c   :  { %1175 = vmatmul.mubr.msk.f32.gmra.mxu0 %vm373_vm0, %v50_v35  ;;  %1211 = vmatmul.mubr.msk.f32.gmra.mxu1 %vm373_vm0, %v74_v36  ;;  %v120_v23 = vld [vmem:[%s1887_s4 + $0xf8] sm:$0xff]  ;;  %v126_v25 = vld [vmem:[%s1887_s4 + $0x128] sm:$0xff]  ;;  %v125_v26 = vld [vmem:[%s1887_s4 + $0x120] sm:$0xff] }
  0x2d   :  { %204 = vperm.xlu1 %1245, %v102_v37   ;;  %199 = vperm.xlu0 %1244, %v101_v38   ;;  %v130_v27 = vld [vmem:[%s1887_s4 + $0x148] sm:$0xff]  ;;  %v129_v28 = vld [vmem:[%s1887_s4 + $0x140] sm:$0xff]  ;;  %v131_v29 = vld [vmem:[%s1887_s4 + $0x150] sm:$0xff] }
  0x2e   :  { %1177 = vmatprep.mubr.msk.f32.mxu0 %vm373_vm0, %v51_v39  ;;  %1213 = vmatprep.mubr.msk.f32.mxu1 %vm373_vm0, %v75_v40  ;;  %v127_v30 = vld [vmem:[%s1887_s4 + $0x130] sm:$0xff]  ;;  %v132_v31 = vld [vmem:[%s1887_s4 + $0x158] sm:$0xff]  ;;  %v982_v33 = vld [vmem:[%s1888_s5 + $0x8] sm:$0xff] }
  0x2f   :  { %v128_v32 = vld [vmem:[%s1887_s4 + $0x138] sm:$0xff]  ;;  %v981_v34 = vld [vmem:[%s1888_s5] sm:$0xff]  ;;  %v983_v36 = vld [vmem:[%s1888_s5 + $0x10] sm:$0xff] }
  0x30   :  { %1178 = vmatmul.mubr.msk.f32.gmra.mxu0 %vm373_vm0, %v52_v41  ;;  %1214 = vmatmul.mubr.msk.f32.gmra.mxu1 %vm373_vm0, %v76_v42  ;;  %v984_v35 = vld [vmem:[%s1888_s5 + $0x18] sm:$0xff] }
  0x31   :  { %214 = vperm.xlu1 %1245, %v104_v43   ;;  %209 = vperm.xlu0 %1244, %v103_v44  }
  0x32   :  { %1180 = vmatprep.mubr.msk.f32.mxu0 %vm373_vm0, %v53_v45  ;;  %1216 = vmatprep.mubr.msk.f32.mxu1 %vm373_vm0, %v77_v46 }
  0x34   :  { %1181 = vmatmul.mubr.msk.f32.gmra.mxu0 %vm373_vm0, %v54_v47  ;;  %1217 = vmatmul.mubr.msk.f32.gmra.mxu1 %vm373_vm0, %v78_v48 }
  0x35   :  { %304 = vperm.xlu1 %1245, %v122_v49   ;;  %299 = vperm.xlu0 %1244, %v121_v50  }
  0x36   :  { %1183 = vmatprep.mubr.msk.f32.mxu0 %vm373_vm0, %v55_v51  ;;  %1219 = vmatprep.mubr.msk.f32.mxu1 %vm373_vm0, %v79_v52 }
  0x38   :  { %1184 = vmatmul.mubr.msk.f32.gmra.mxu0 %vm373_vm0, %v56_v53  ;;  %1220 = vmatmul.mubr.msk.f32.gmra.mxu1 %vm373_vm0, %v80_v54 }
  0x39   :  { %219 = vperm.xlu1 %1245, %v105_v55   ;;  %309 = vperm.xlu0 %1244, %v123_v56  }
  0x3a   :  { %1186 = vmatprep.mubr.msk.f32.mxu0 %vm373_vm0, %v57_v57  ;;  %1222 = vmatprep.mubr.msk.f32.mxu1 %vm373_vm0, %v81_v58 }
  0x3c   :  { %1187 = vmatmul.mubr.msk.f32.gmra.mxu0 %vm373_vm0, %v58_v59  ;;  %1223 = vmatmul.mubr.msk.f32.gmra.mxu1 %vm373_vm0, %v82_v60 }
  0x3d   :  { %314 = vperm.xlu1 %1245, %v124_v61   ;;  %224 = vperm.xlu0 %1244, %v106_v62  }
  0x3e   :  { %1189 = vmatprep.mubr.msk.f32.mxu0 %vm373_vm0, %v59_v63  ;;  %1225 = vmatprep.mubr.msk.f32.mxu1 %vm373_vm0, %v83_v0 }
  0x40   :  { %1190 = vmatmul.mubr.msk.f32.gmra.mxu0 %vm373_vm0, %v60_v1  ;;  %1226 = vmatmul.mubr.msk.f32.gmra.mxu1 %vm373_vm0, %v84_v2 }
  0x41   :  { %239 = vperm.xlu1 %1245, %v109_v3   ;;  %229 = vperm.xlu0 %1244, %v107_v4  }
  0x42   :  { %1192 = vmatprep.mubr.msk.f32.mxu0 %vm373_vm0, %v61_v5  ;;  %1228 = vmatprep.mubr.msk.f32.mxu1 %vm373_vm0, %v85_v6 }
  0x44   :  { %1193 = vmatmul.mubr.msk.f32.gmra.mxu0 %vm373_vm0, %v62_v7  ;;  %1229 = vmatmul.mubr.msk.f32.gmra.mxu1 %vm373_vm0, %v86_v8 }
  0x45   :  { %234 = vperm.xlu1 %1245, %v108_v9   ;;  %244 = vperm.xlu0 %1244, %v110_v10   ;;  %v859_v10 = vlaneseq }
  0x46   :  { %1195 = vmatprep.mubr.msk.f32.mxu0 %vm373_vm0, %v63_v11  ;;  %1231 = vmatprep.mubr.msk.f32.mxu1 %vm373_vm0, %v87_v12 }
  0x48   :  { %1196 = vmatmul.mubr.msk.f32.gmra.mxu0 %vm373_vm0, %v64_v13  ;;  %1232 = vmatmul.mubr.msk.f32.gmra.mxu1 %vm373_vm0, %v88_v14 }
  0x49   :  { %259 = vperm.xlu1 %1245, %v113_v15   ;;  %249 = vperm.xlu0 %1244, %v111_v16   ;;  %v860_v16 = vshrl.u32 %v859_v10, 7 }
  0x4b   :  { %v885_v10 = vsub.s32 2, %v860_v16 }
  0x4d   :  { %254 = vperm.xlu1 %1245, %v112_v17   ;;  %264 = vperm.xlu0 %1244, %v114_v18  }
  0x51   :  { %279 = vperm.xlu1 %1245, %v117_v19   ;;  %269 = vperm.xlu0 %1244, %v115_v20  }
  0x55   :  { %274 = vperm.xlu1 %1245, %v116_v21   ;;  %284 = vperm.xlu0 %1244, %v118_v22   ;;  %v861_v22 = vsub.s32 0, %v860_v16 }
  0x59   :  { %294 = vperm.xlu1 %1245, %v120_v23   ;;  %289 = vperm.xlu0 %1244, %v119_v24  }
  0x5d   :  { %324 = vperm.xlu1 %1245, %v126_v25   ;;  %319 = vperm.xlu0 %1244, %v125_v26   ;;  %v1723_v26 = vld [vmem:[%s1884_s1] sm:$0xff]  ;;  %s1101_s1 = sld [smem:[#allocation2 + $0x1]] }
  0x5e   :  { %1899 = vst [vmem:[#allocation12_spill] sm:$0xff] %v1723_v26 }
  0x61   :  { %344 = vperm.xlu1 %1245, %v130_v27   ;;  %339 = vperm.xlu0 %1244, %v129_v28   ;;  %v933_v28 = vsub.s32 6, %v860_v16 }
  0x65   :  { %349 = vperm.xlu1 %1245, %v131_v29   ;;  %329 = vperm.xlu0 %1244, %v127_v30  }
  0x69   :  { %354 = vperm.xlu1 %1245, %v132_v31   ;;  %334 = vperm.xlu0 %1244, %v128_v32   ;;  %v873_v32 = vsub.s32 1, %v860_v16 }
  0x6d   :  { %992 = vperm.xlu1 %1245, %v982_v33   ;;  %987 = vperm.xlu0 %1244, %v981_v34  }
  0x71   :  { %1002 = vperm.xlu1 %1245, %v984_v35   ;;  %997 = vperm.xlu0 %1244, %v983_v36   ;;  %v945_v36 = vsub.s32 7, %v860_v16 }
  0x8d   :  { %v140_v37 = vpop.permute.xlu0 %139  ;;  %v1656_v38 = vpop.permute.xlu1 %149 }
  0x92   :  { %v145_v39 = vpop.permute.xlu0 %144  ;;  %v1658_v40 = vpop.permute.xlu1 %154 }
  0x98   :  { %v1660_v41 = vpop.permute.xlu0 %159  ;;  %v1662_v42 = vpop.permute.xlu1 %164 }
  0x9c   :  { %v1664_v43 = vpop.permute.xlu0 %169  ;;  %v1666_v44 = vpop.permute.xlu1 %174 }
  0xa0   :  { %v1668_v45 = vpop.permute.xlu0 %179  ;;  %v1670_v46 = vpop.permute.xlu1 %184 }
  0xa4   :  { %v1672_v47 = vpop.permute.xlu0 %189  ;;  %v1674_v48 = vpop.permute.xlu1 %194 }
  0xa8   :  { %v1676_v49 = vpop.permute.xlu0 %199  ;;  %v1678_v50 = vpop.permute.xlu1 %204 }
  0xac   :  { %v1680_v51 = vpop.permute.xlu0 %209  ;;  %v1682_v52 = vpop.permute.xlu1 %214 }
  0xad   :  { %1892 = vst [vmem:[#allocation5_spill] sm:$0xff] %v1680_v51 }
  0xb0   :  { %v1684_v53 = vpop.permute.xlu0 %299  ;;  %v1686_v54 = vpop.permute.xlu1 %304 }
  0xb4   :  { %v1688_v55 = vpop.permute.xlu0 %309  ;;  %v1690_v56 = vpop.permute.xlu1 %219 }
  0xb8   :  { %v1692_v57 = vpop.permute.xlu0 %224  ;;  %v1694_v58 = vpop.permute.xlu1 %314 }
  0xbc   :  { %v1696_v59 = vpop.permute.xlu0 %229  ;;  %v1698_v60 = vpop.permute.xlu1 %239 }
  0xbd   :  { %1893 = vst [vmem:[#allocation6_spill] sm:$0xff] %v1696_v59  ;;  %1894 = vst [vmem:[#allocation7_spill] sm:$0xff] %v1698_v60  ;;  %v909_v59 = vsub.s32 4, %v860_v16 }
  0xc0   :  { %v1700_v61 = vpop.permute.xlu0 %244  ;;  %v1702_v62 = vpop.permute.xlu1 %234 }
  0xc1   :  { %1895 = vst [vmem:[#allocation8_spill] sm:$0xff] %v1700_v61  ;;  %v897_v61 = vsub.s32 3, %v860_v16 }
  0xc4   :  { %v1704_v1 = vpop.permute.xlu0 %249  ;;  %v260_v6 = vpop.permute.xlu1 %259 }
  0xc5   :  { %1896 = vst [vmem:[#allocation9_spill] sm:$0xff] %v1704_v1 }
  0xc8   :  { %v265_v9 = vpop.permute.xlu0 %264  ;;  %v1710_v15 = vpop.permute.xlu1 %254 }
  0xc9   :  { %1897 = vst [vmem:[#allocation10_spill] sm:$0xff] %v1710_v15 }
  0xcc   :  { %v270_v19 = vpop.permute.xlu0 %269  ;;  %v1718_v25 = vpop.permute.xlu1 %279 }
  0xd0   :  { %v285_v35 = vpop.permute.xlu0 %284 }
  0xdc   :  { %v1164_v63 = vpop.f32.mrf.mxu0  ;;  %v1200_v0 = vpop.f32.mrf.mxu1 }
  0xdd   :  { %v590_v27 = vadd.f32 %v1164_v63, %v145_v39  ;;  %v710_v29 = vadd.f32 %v1200_v0, %v265_v9  ;;  %v1728_v39 = vrot.slane %v1723_v26, %v933_v28  ;;  %v921_v63 = vsub.s32 5, %v860_v16 }
  0xde   :  { %v584_v2 = vpop.f32.mrf.mxu0  ;;  %v704_v3 = vpop.f32.mrf.mxu1  ;;  %v1740_v28 = vrot.slane %v1723_v26, %v945_v36 }
  0xdf   :  { %v585_v30 = vadd.f32 %v584_v2, %v140_v37  ;;  %v705_v31 = vadd.f32 %v704_v3, %v260_v6  ;;  %v820_v51 = vand.u32 2147483647, %v590_v27  ;;  %v844_v0 = vand.u32 2147483647, %v710_v29 }
  0xe0   :  { %v1167_v4 = vpop.f32.mrf.mxu0  ;;  %v1203_v5 = vpop.f32.mrf.mxu1  ;;  %v1732_v6 = vrot.slane %v1723_v26, %v873_v32  ;;  %v1753_v32 = vrot.slane %v1723_v26, %v909_v59  ;;  %v1759_v36 = vrot.slane %v1723_v26, %v921_v63 }
  0xe1   :  { %v600_v1 = vadd.f32 %v1167_v4, %v1658_v40  ;;  %v819_v2 = vand.u32 2147483647, %v585_v30  ;;  %v843_v3 = vand.u32 2147483647, %v705_v31  ;;  %v275_v4 = vpop.permute.xlu1 %274  ;;  %v1748_v30 = vrot.slane %v1723_v26, %v897_v61 }
  0xe2   :  { %v594_v7 = vpop.f32.mrf.mxu0  ;;  %v1706_v8 = vpop.f32.mrf.mxu1  ;;  %v1745_v16 = vadd.f32 %v1203_v5, %v275_v4 }
  0xe3   :  { %v595_v37 = vadd.f32 %v594_v7, %v1656_v38  ;;  %v1743_v38 = vrot.slane %v1723_v26, %v885_v10  ;;  %v822_v7 = vand.u32 2147483647, %v600_v1  ;;  %v1762_v1 = vmul.f32 %v1728_v39, %v844_v0 }
  0xe4   :  { %v1170_v11 = vpop.f32.mrf.mxu0  ;;  %v1206_v12 = vpop.f32.mrf.mxu1  ;;  %v1765_v61 = vmul.f32 %v1728_v39, %v843_v3  ;;  %v846_v0 = vand.u32 2147483647, %v1745_v16 }
  0xe5   :  { %v730_v27 = vadd.f32 %v1206_v12, %v285_v35  ;;  %v821_v12 = vand.u32 2147483647, %v595_v37 }
  0xe6   :  { %v604_v13 = vpop.f32.mrf.mxu0  ;;  %v1708_v14 = vpop.f32.mrf.mxu1 }
  0xe7   :  { %v605_v35 = vadd.f32 %v604_v13, %v1660_v41  ;;  %v848_v41 = vand.u32 2147483647, %v730_v27 }
  0xe8   :  { %v1173_v17 = vpop.f32.mrf.mxu0  ;;  %v1712_v18 = vpop.f32.mrf.mxu1 }
  0xe9   :  { %v620_v10 = vadd.f32 %v1173_v17, %v1666_v44  ;;  %v823_v17 = vand.u32 2147483647, %v605_v35 }
  0xea   :  { %v1714_v20 = vpop.f32.mrf.mxu0  ;;  %v1716_v21 = vpop.f32.mrf.mxu1 }
  0xeb   :  { %1898 = vst [vmem:[#allocation11_spill] sm:$0xff] %v1716_v21  ;;  %v862_v21 = vrot.slane %v1723_v26, %v861_v22  ;;  %v610_v22 = vadd.f32 %v1170_v11, %v1662_v42  ;;  %v1755_v42 = vpop.permute.xlu0 %289 }
  0xec   :  { %v1176_v23 = vpop.f32.mrf.mxu0  ;;  %v1212_v24 = vpop.f32.mrf.mxu1 }
  0xed   :  { %v864_v11 = vmul.f32 %v862_v21, %v820_v51  ;;  %v863_v5 = vmul.f32 %v862_v21, %v819_v2  ;;  %v1771_v51 = vadd.f32 %v1706_v8, %v270_v19  ;;  %v824_v37 = vand.u32 2147483647, %v610_v22 }
  0xee   :  { %v624_v33 = vpop.f32.mrf.mxu0  ;;  %v744_v34 = vpop.f32.mrf.mxu1  ;;  %v630_v13 = vadd.f32 %v1176_v23, %v1670_v46  ;;  %v866_v63 = vmul.f32 %v862_v21, %v822_v7  ;;  %v750_v2 = vadd.f32 %v1212_v24, %v1686_v54  ;;  %v865_v44 = vmul.f32 %v862_v21, %v821_v12 }
  0xef   :  { %v625_v3 = vadd.f32 %v624_v33, %v1668_v45  ;;  %v1783_v19 = vadd.f32 %v1708_v14, %v1718_v25  ;;  %v826_v46 = vand.u32 2147483647, %v620_v10  ;;  %v615_v23 = vadd.f32 %v1714_v20, %v1664_v43  ;;  %v295_v33 = vpop.permute.xlu1 %294  ;;  %v1790_v21 = vpop.permute.xlu0 %319 }
  0xf0   :  { %v1179_v15 = vpop.f32.mrf.mxu0  ;;  %v1215_v60 = vpop.f32.mrf.mxu1  ;;  %v1798_v25 = vadd.f32 %v1712_v18, %v295_v33  ;;  %v868_v43 = vadd.f32 %v864_v11, %v750_v2  ;;  %v875_v22 = vmul.f32 %v1732_v6, %v823_v17 }
  0xf1   :  { %v640_v8 = vadd.f32 %v1179_v15, %v1674_v48  ;;  %v760_v54 = vadd.f32 %v1215_v60, %v1694_v58  ;;  %v1794_v48 = vmul.f32 %v1740_v28, %v848_v41  ;;  %v828_v15 = vand.u32 2147483647, %v630_v13 }
  0xf2   :  { %v1734_v9 = vpop.f32.mrf.mxu0  ;;  %v1736_v40 = vpop.f32.mrf.mxu1  ;;  %v827_v20 = vand.u32 2147483647, %v625_v3  ;;  %v878_v35 = vmul.f32 %v1732_v6, %v826_v46  ;;  %v825_v10 = vand.u32 2147483647, %v615_v23  ;;  %v1902_v46 = vld [vmem:[#allocation5_spill] sm:$0xff] }
  0xf3   :  { %v830_v7 = vand.u32 2147483647, %v640_v8  ;;  %v755_v41 = vadd.f32 %v1736_v40, %v1688_v55  ;;  %v1820_v2 = vpop.permute.xlu0 %339  ;;  %v847_v33 = vand.u32 2147483647, %v1783_v19 }
  0xf4   :  { %v1182_v29 = vpop.f32.mrf.mxu0  ;;  %v1750_v31 = vpop.f32.mrf.mxu1 }
  0xf5   :  { %1900 = vst [vmem:[#allocation13_spill] sm:$0xff] %v1750_v31  ;;  %v650_v14 = vadd.f32 %v1182_v29, %v1678_v50  ;;  %v870_v50 = vadd.f32 %v866_v63, %v760_v54 }
  0xf6   :  { %v644_v59 = vpop.f32.mrf.mxu0  ;;  %v1768_v4 = vpop.f32.mrf.mxu1 }
  0xf7   :  { %1901 = vst [vmem:[#allocation14_spill] sm:$0xff] %v1768_v4  ;;  %v745_v4 = vadd.f32 %v744_v34, %v1684_v53  ;;  %v876_v53 = vmul.f32 %v1732_v6, %v824_v37  ;;  %v645_v58 = vadd.f32 %v644_v59, %v1676_v49  ;;  %v888_v49 = vmul.f32 %v1743_v38, %v828_v15 }
  0xf8   :  { %v1185_v26 = vpop.f32.mrf.mxu0  ;;  %v1777_v31 = vpop.f32.mrf.mxu1  ;;  %v635_v59 = vadd.f32 %v1734_v9, %v1672_v47  ;;  %v832_v37 = vand.u32 2147483647, %v650_v14  ;;  %v890_v47 = vmul.f32 %v1743_v38, %v830_v7  ;;  %v882_v17 = vadd.f32 %v878_v35, %v870_v50  ;;  %v1904_v35 = vld [vmem:[#allocation8_spill] sm:$0xff] }
  0xf9   :  { %v867_v27 = vadd.f32 %v863_v5, %v745_v4  ;;  %v660_v18 = vadd.f32 %v1185_v26, %v1682_v52  ;;  %v880_v4 = vadd.f32 %v876_v53, %v868_v43  ;;  %v831_v13 = vand.u32 2147483647, %v645_v58  ;;  %v1818_v26 = vpop.permute.xlu1 %324 }
  0xfa   :  { %v654_v45 = vpop.f32.mrf.mxu0  ;;  %v1788_v24 = vpop.f32.mrf.mxu1  ;;  %v877_v53 = vmul.f32 %v1732_v6, %v825_v10  ;;  %v829_v15 = vand.u32 2147483647, %v635_v59  ;;  %v900_v14 = vmul.f32 %v1748_v30, %v832_v37  ;;  %v869_v43 = vadd.f32 %v865_v44, %v755_v41 }
  0xfb   :  { %v879_v3 = vadd.f32 %v875_v22, %v867_v27  ;;  %v834_v8 = vand.u32 2147483647, %v660_v18  ;;  %v655_v23 = vadd.f32 %v654_v45, %v1902_v46  ;;  %v892_v45 = vadd.f32 %v888_v49, %v880_v4  ;;  %v1836_v37 = vpop.permute.xlu0 %329  ;;  %v1905_v4 = vld [vmem:[#allocation7_spill] sm:$0xff] }
  0xfc   :  { %v1188_v60 = vpop.f32.mrf.mxu0  ;;  %v1801_v34 = vpop.f32.mrf.mxu1  ;;  %v894_v19 = vadd.f32 %v890_v47, %v882_v17 }
  0xfd   :  { %v670_v12 = vadd.f32 %v1188_v60, %v1692_v57  ;;  %v887_v57 = vmul.f32 %v1743_v38, %v827_v20  ;;  %v899_v20 = vmul.f32 %v1748_v30, %v831_v13  ;;  %v902_v6 = vmul.f32 %v1748_v30, %v834_v8  ;;  %v345_v59 = vpop.permute.xlu1 %344 }
  0xfe   :  { %v664_v29 = vpop.f32.mrf.mxu0  ;;  %v1807_v11 = vpop.f32.mrf.mxu1  ;;  %v833_v10 = vand.u32 2147483647, %v655_v23  ;;  %v904_v41 = vadd.f32 %v900_v14, %v892_v45  ;;  %v881_v13 = vadd.f32 %v877_v53, %v869_v43  ;;  %v1906_v23 = vld [vmem:[#allocation10_spill] sm:$0xff] }
  0xff   :  { %v665_v5 = vadd.f32 %v664_v29, %v1690_v56  ;;  %v836_v9 = vand.u32 2147483647, %v670_v12  ;;  %v891_v7 = vadd.f32 %v887_v57, %v879_v3 }
 0x100   :  { %v1191_v63 = vpop.f32.mrf.mxu0  ;;  %v1816_v52 = vpop.f32.mrf.mxu1 }
 0x101   :  { %v680_v56 = vadd.f32 %v1191_v63, %v1702_v62  ;;  %v835_v54 = vand.u32 2147483647, %v665_v5  ;;  %v1903_v62 = vld [vmem:[#allocation6_spill] sm:$0xff]  ;;  %v912_v12 = vmul.f32 %v1753_v32, %v836_v9  ;;  %v889_v5 = vmul.f32 %v1743_v38, %v829_v15 }
 0x102   :  { %v674_v55 = vpop.f32.mrf.mxu0  ;;  %v1825_v40 = vpop.f32.mrf.mxu1  ;;  %v903_v63 = vadd.f32 %v899_v20, %v891_v7  ;;  %v906_v38 = vadd.f32 %v902_v6, %v894_v19  ;;  %v901_v15 = vmul.f32 %v1748_v30, %v833_v10  ;;  %v938_v10 = vmul.f32 %v1728_v39, %v846_v0 }
 0x103   :  { %v838_v58 = vand.u32 2147483647, %v680_v56  ;;  %v675_v60 = vadd.f32 %v674_v55, %v1903_v62  ;;  %v911_v18 = vmul.f32 %v1753_v32, %v835_v54  ;;  %v916_v17 = vadd.f32 %v912_v12, %v904_v41  ;;  %v350_v6 = vpop.permute.xlu1 %349 }
 0x104   :  { %v1194_v22 = vpop.f32.mrf.mxu0  ;;  %v1230_v27 = vpop.f32.mrf.mxu1  ;;  %v850_v55 = vand.u32 2147483647, %v1798_v25  ;;  %v893_v7 = vadd.f32 %v889_v5, %v881_v13  ;;  %v785_v0 = vadd.f32 %v1807_v11, %v1820_v2 }
 0x105   :  { %v690_v50 = vadd.f32 %v1194_v22, %v1904_v35  ;;  %v914_v3 = vmul.f32 %v1753_v32, %v838_v58  ;;  %v837_v47 = vand.u32 2147483647, %v675_v60  ;;  %v915_v14 = vadd.f32 %v911_v18, %v903_v63  ;;  %v1907_v60 = vld [vmem:[#allocation9_spill] sm:$0xff]  ;;  %v1908_v27 = vld [vmem:[#allocation11_spill] sm:$0xff] }
 0x106   :  { %v684_v44 = vpop.f32.mrf.mxu0  ;;  %v804_v29 = vpop.f32.mrf.mxu1  ;;  %v735_v45 = vadd.f32 %v1908_v27, %v1755_v42  ;;  %v845_v18 = vand.u32 2147483647, %v1771_v51  ;;  %v947_v42 = vmul.f32 %v1740_v28, %v847_v33  ;;  %v790_v63 = vadd.f32 %v1801_v34, %v345_v59  ;;  %v1909_v27 = vld [vmem:[#allocation14_spill] sm:$0xff] }
 0x107   :  { %v840_v49 = vand.u32 2147483647, %v690_v50  ;;  %v685_v57 = vadd.f32 %v684_v44, %v1905_v4  ;;  %v918_v12 = vadd.f32 %v914_v3, %v906_v38  ;;  %v913_v35 = vmul.f32 %v1753_v32, %v837_v47  ;;  %v1856_v44 = vpop.permute.xlu0 %334 }
 0x108   :  { %v1197_v9 = vpop.f32.mrf.mxu0  ;;  %v1233_v56 = vpop.f32.mrf.mxu1  ;;  %v905_v29 = vadd.f32 %v901_v15, %v893_v7  ;;  %v849_v4 = vand.u32 2147483647, %v735_v45  ;;  %v937_v33 = vmul.f32 %v1728_v39, %v845_v18  ;;  %v765_v45 = vadd.f32 %v1909_v27, %v1790_v21 }
 0x109   :  { %v924_v8 = vmul.f32 %v1759_v36, %v840_v49  ;;  %v839_v46 = vand.u32 2147483647, %v685_v57  ;;  %v700_v54 = vadd.f32 %v1197_v9, %v1906_v23  ;;  %v950_v49 = vmul.f32 %v1740_v28, %v850_v55  ;;  %v355_v9 = vpop.permute.xlu1 %354 }
 0x10a   :  { %v694_v62 = vpop.f32.mrf.mxu0  ;;  %v812_v53 = vpop.f32.mrf.mxu1  ;;  %v917_v16 = vadd.f32 %v913_v35, %v905_v29 }
 0x10b   :  { %v928_v43 = vadd.f32 %v924_v8, %v916_v17  ;;  %v923_v20 = vmul.f32 %v1759_v36, %v839_v46  ;;  %v842_v58 = vand.u32 2147483647, %v700_v54  ;;  %v695_v22 = vadd.f32 %v694_v62, %v1907_v60  ;;  %v988_v56 = vpop.permute.xlu0 %987 }
 0x10c   :  { %v949_v17 = vmul.f32 %v1740_v28, %v849_v4  ;;  %v855_v46 = vmax.f32 %v785_v0, 0.0  ;;  %v856_v54 = vmax.f32 %v790_v63, 0.0  ;;  %v1911_v4 = vld [vmem:[#allocation12_spill] sm:$0xff] }
 0x10d   :  { %v940_v25 = vadd.f32 %v1762_v1, %v928_v43  ;;  %v927_v50 = vadd.f32 %v923_v20, %v915_v14  ;;  %v926_v30 = vmul.f32 %v1759_v36, %v842_v58  ;;  %v841_v19 = vand.u32 2147483647, %v695_v22  ;;  %v993_v38 = vpop.permute.xlu1 %992 }
 0x10e   :  { %v1005_v55 = vmul.f32 %v988_v56, %v855_v46  ;;  %v1006_v62 = vmul.f32 %v993_v38, %v856_v54  ;;  %v1033_v54 = vstv %s979_s17 }
 0x10f   :  { %v952_v32 = vadd.f32 %v1794_v48, %v940_v25  ;;  %v939_v1 = vadd.f32 %v1765_v61, %v927_v50  ;;  %v930_v5 = vadd.f32 %v926_v30, %v918_v12  ;;  %v925_v41 = vmul.f32 %v1759_v36, %v841_v19  ;;  %v998_v15 = vpop.permute.xlu0 %997 }
 0x110   :  { %v795_v61 = vadd.f32 %v1825_v40, %v350_v6  ;;  %v800_v40 = vadd.f32 %v1816_v52, %v355_v9  ;;  %v1009_v53 = vadd.f32 %v1006_v62, %v1005_v55  ;;  %v1910_v52 = vld [vmem:[#allocation13_spill] sm:$0xff]  ;;  %v775_v19 = vadd.f32 %v1788_v24, %v1836_v37 }
 0x111   :  { %v960_v51 = vmin.f32 %v952_v32, 0.0  ;;  %v951_v57 = vadd.f32 %v947_v42, %v939_v1  ;;  %v942_v13 = vadd.f32 %v938_v10, %v930_v5  ;;  %v929_v48 = vadd.f32 %v925_v41, %v917_v16  ;;  %v1003_v58 = vpop.permute.xlu1 %1002 }
 0x112   :  { %v857_v39 = vmax.f32 %v795_v61, 0.0  ;;  %v858_v43 = vmax.f32 %v800_v40, 0.0  ;;  %v770_v25 = vadd.f32 %v1910_v52, %v1818_v26  ;;  %v851_v6 = vand.u32 2147483647, %v765_v45 }
 0x113   :  { %v965_v3 = vmul.f32 1.442695, %v960_v51  ;;  %v959_v47 = vmin.f32 %v951_v57, 0.0  ;;  %v954_v36 = vadd.f32 %v950_v49, %v942_v13  ;;  %v941_v8 = vadd.f32 %v937_v33, %v929_v48 }
 0x114   :  { %v1007_v28 = vmul.f32 %v998_v15, %v857_v39  ;;  %v1008_v60 = vmul.f32 %v1003_v58, %v858_v43  ;;  %vm955_vm1 = vcmp.gt.f32.partialorder %v951_v57, 0.0  ;;  %vm956_vm2 = vcmp.gt.f32.partialorder %v952_v32, 0.0 }
 0x115   :  { %1246 = vpow2.f32 %v965_v3  ;;  %v963_v11 = vmul.f32 1.442695, %v959_v47  ;;  %v962_v2 = vmin.f32 %v954_v36, 0.0  ;;  %v953_v23 = vadd.f32 %v949_v17, %v941_v8 }
 0x116   :  { %v1010_v20 = vadd.f32 %v1009_v53, %v1007_v28  ;;  %v852_v21 = vand.u32 2147483647, %v770_v25  ;;  %v780_v5 = vadd.f32 %v1777_v31, %v1856_v44  ;;  %v853_v49 = vand.u32 2147483647, %v775_v19 }
 0x117   :  { %1248 = vpow2.f32 %v963_v11  ;;  %v969_v34 = vmul.f32 1.442695, %v962_v2  ;;  %v961_v59 = vmin.f32 %v953_v23, 0.0  ;;  %v1036_v16 = vrot.slane %v1911_v4, 4 }
 0x118   :  { %v1011_v7 = vadd.f32 %v1010_v20, %v1008_v60  ;;  %vm958_vm3 = vcmp.gt.f32.partialorder %v954_v36, 0.0  ;;  %vm957_vm4 = vcmp.gt.f32.partialorder %v953_v23, 0.0  ;;  %v854_v13 = vand.u32 2147483647, %v780_v5 }
 0x119   :  { %1250 = vpow2.f32 %v969_v34  ;;  %v967_v14 = vmul.f32 1.442695, %v961_v59  ;;  %v1037_v61 = vadd.f32 %v1036_v16, %v1911_v4 }
 0x11a   :  { %v1012_v10 = vrot.slane %v1011_v7, 4 }
 0x11b   :  { %1252 = vpow2.f32 %v967_v14  ;;  %v1038_v47 = vrot.slane %v1037_v61, 2 }
 0x11c   :  { %v1013_v0 = vadd.f32 %v1012_v10, %v1011_v7 }
 0x11d   :  { %v1039_v8 = vadd.f32 %v1038_v47, %v1037_v61 }
 0x11e   :  { %v1014_v33 = vrot.slane %v1013_v0, 2 }
 0x11f   :  { %v1040_v2 = vrot.slane %v1039_v8, 1 }
 0x120   :  { %v1015_v44 = vadd.f32 %v1014_v33, %v1013_v0 }
 0x121   :  { %v1041_v55 = vadd.f32 %v1040_v2, %v1039_v8 }
 0x122   :  { %v1247_v22 = vpop.eup %1246  ;;  %v1016_v56 = vrot.slane %v1015_v44, 1 }
 0x123   :  { %v1098_v35 = vadd.f32 -1.0, %v1247_v22 }
 0x124   :  { %v1249_v12 = vpop.eup %1248  ;;  %v1017_v46 = vadd.f32 %v1016_v56, %v1015_v44 }
 0x125   :  { %v1097_v50 = vadd.f32 -1.0, %v1249_v12  ;;  %v976_v42 = vsel %vm956_vm2, %v952_v32, %v1098_v35 }
 0x126   :  { %v1251_v30 = vpop.eup %1250  ;;  %v1021_v51 = vmul.f32 %v976_v42, %v852_v21 }
 0x127   :  { %v975_v18 = vsel %vm955_vm1, %v951_v57, %v1097_v50  ;;  %v1100_v29 = vadd.f32 -1.0, %v1251_v30 }
 0x128   :  { %v1253_v1 = vpop.eup %1252  ;;  %v1020_v41 = vmul.f32 %v975_v18, %v851_v6 }
 0x129   :  { %v1099_v26 = vadd.f32 -1.0, %v1253_v1  ;;  %v978_v24 = vsel %vm958_vm3, %v954_v36, %v1100_v29 }
 0x12a   :  { %v1024_v57 = vadd.f32 %v1021_v51, %v1020_v41  ;;  %v1023_v63 = vmul.f32 %v978_v24, %v854_v13 }
 0x12b   :  { %v977_v37 = vsel %vm957_vm4, %v953_v23, %v1099_v26  ;;  %v1018_v23 = vstv %s1101_s1 }
 0x12c   :  { %v1022_v32 = vmul.f32 %v977_v37, %v853_v49  ;;  %v1019_v34 = vadd.f32 %v1018_v23, %v1017_v46 }
 0x12e   :  { %v1025_v48 = vadd.f32 %v1024_v57, %v1022_v32 }
 0x130   :  { %v1026_v31 = vadd.f32 %v1025_v48, %v1023_v63 }
 0x132   :  { %v1027_v3 = vrot.slane %v1026_v31, 4 }
 0x134   :  { %v1028_v9 = vadd.f32 %v1027_v3, %v1026_v31 }
 0x136   :  { %v1029_v17 = vrot.slane %v1028_v9, 2 }
 0x138   :  { %v1030_v36 = vadd.f32 %v1029_v17, %v1028_v9 }
 0x13a   :  { %v1031_v11 = vrot.slane %v1030_v36, 1 }
 0x13c   :  { %v1032_v39 = vadd.f32 %v1031_v11, %v1030_v36 }
 0x13e   :  { %v1034_v59 = vmul.f32 %v1033_v54, %v1032_v39 }
 0x140   :  { %v1035_v40 = vadd.f32 %v1034_v59, %v1019_v34 }
 0x142   :  { %v1042_v38 = vadd.f32 %v1041_v55, %v1035_v40 }
 0x144   :  { %1043 = vst [vmem:[%s1889_s6] sm:$0x1] %v1042_v38 }
 0x145   :  { %1048 = vsyncpa [#allocation3], 1 }

</bundles_post_ra>
